<compile_context>
chip_gen: v7x
topology: tpu7x:2x2x1
jax: 0.10.0
libtpu: 0.0.40
codegen_flags: <defaults>
</compile_context>

<pallas_src>
import functools
import math

import jax
import jax.numpy as jnp
from jax.experimental import pallas as pl
from jax.experimental.pallas import tpu as pltpu


LANE = 128


def _round_up(n, m):
    return ((n + m - 1) // m) * m


# ---------------------------------------------------------------------------
# Pallas kernel: whole fused MLP hot path (5 matmuls + bias + ReLU).
# ---------------------------------------------------------------------------
def basenet_kernel(x_ref, *refs):
    """refs = (w1, b1, w2, b2, ..., w5, b5, o_ref)."""
    o_ref = refs[-1]
    layer_refs = refs[:-1]
    n_layers = len(layer_refs) // 2

    h = x_ref[...]  # bf16 (tile_b, Fp)
    for i in range(n_layers):
        w_ref = layer_refs[2 * i]
        b_ref = layer_refs[2 * i + 1]
        # bf16 x bf16 -> f32 accumulation on the MXU.
        acc = jnp.dot(h, w_ref[...], preferred_element_type=jnp.float32)
        acc = acc + b_ref[...]           # folded BN/bias shift, f32 epilogue
        if i < n_layers - 1:
            # ReLU in f32, then narrow to bf16 for the next matmul.
            h = jnp.maximum(acc, 0.0).astype(jnp.bfloat16)
        else:
            h = acc                      # last layer: BN affine only, no ReLU
    o_ref[...] = h.astype(o_ref.dtype)


# ---------------------------------------------------------------------------
# Wrapper: pallas_call with a 1-D grid over the (padded) batch dimension.
# ---------------------------------------------------------------------------
def basenet_forward(x, params, *, tile_b=128):
    """x: (B, in_features) float32.  params: list of (w_bf16, shift_f32)."""
    B, F = x.shape
    Fp = params[0][0].shape[0]          # padded in_features
    out_dim = params[-1][0].shape[1]    # 128

    # Pad batch to a multiple of tile_b and features to the padded width.
    Bp = _round_up(max(B, 1), tile_b)
    xp = jnp.zeros((Bp, Fp), jnp.float32).at[:B, :F].set(x)
    xp = xp.astype(jnp.bfloat16)

    grid = (Bp // tile_b,)

    # Full-array specs for the (small, grid-constant) weights / shifts.
    def full_spec(arr):
        return pl.BlockSpec(arr.shape, lambda i: (0, 0))

    in_specs = [pl.BlockSpec((tile_b, Fp), lambda i: (i, 0))]   # x tile
    flat_params = []
    for w, b in params:
        in_specs += [full_spec(w), full_spec(b)]
        flat_params += [w, b]

    out = pl.pallas_call(
        basenet_kernel,
        out_shape=jax.ShapeDtypeStruct((Bp, out_dim), jnp.float32),
        grid_spec=pltpu.PrefetchScalarGridSpec(
            num_scalar_prefetch=0,
            grid=grid,
            in_specs=in_specs,
            out_specs=pl.BlockSpec((tile_b, out_dim), lambda i: (i, 0)),
        ),
        compiler_params=pltpu.CompilerParams(
            dimension_semantics=("parallel",),
        ),
    )(xp, *flat_params)

    return out[:B]


# ---------------------------------------------------------------------------
# Deterministic parameter construction (shapes from BaseNet_1.__init__), with
# BatchNorm (eval mode) + Linear bias folded into the weights / shift, padded
# to lane-aligned (multiple-of-128) feature dims, weights stored bf16.
# ---------------------------------------------------------------------------
def make_params(key, in_features):
    h1 = int(in_features * 0.8)
    h2 = int(in_features * 0.6)
    h3 = int(in_features * 0.4)
    h4 = int(in_features * 0.2)
    dims = [(in_features, h1), (h1, h2), (h2, h3), (h3, h4), (h4, 128)]
    eps = 1e-5

    params = []
    for fan_in, fan_out in dims:
        key, kw, kb, kg, kbeta, km, kv = jax.random.split(key, 7)
        bound = 1.0 / math.sqrt(fan_in)
        # nn.Linear init U(-1/sqrt(fan_in), 1/sqrt(fan_in)); stored (in, out).
        w = jax.random.uniform(kw, (fan_in, fan_out), jnp.float32, -bound, bound)
        b_lin = jax.random.uniform(kb, (fan_out,), jnp.float32, -bound, bound)
        # BatchNorm1d params / running stats (non-trivial but fixed).
        gamma = 1.0 + 0.1 * jax.random.normal(kg, (fan_out,), jnp.float32)
        beta = 0.1 * jax.random.normal(kbeta, (fan_out,), jnp.float32)
        r_mean = 0.1 * jax.random.normal(km, (fan_out,), jnp.float32)
        r_var = jnp.abs(1.0 + 0.1 * jax.random.normal(kv, (fan_out,), jnp.float32))
        # Fold: BN(x @ W + b_lin) = x @ (W * scale) + shift
        scale = gamma / jnp.sqrt(r_var + eps)
        w_folded = w * scale[None, :]
        shift = (b_lin - r_mean) * scale + beta

        # Zero-pad feature dims to multiples of 128; padded columns produce
        # exact zeros (zero weights + zero shift -> ReLU(0)=0 -> zero rows in
        # the next layer), so numerics are unchanged.
        fi_p = _round_up(fan_in, LANE)
        fo_p = _round_up(fan_out, LANE)
        w_p = jnp.zeros((fi_p, fo_p), jnp.float32).at[:fan_in, :fan_out].set(w_folded)
        s_p = jnp.zeros((1, fo_p), jnp.float32).at[0, :fan_out].set(shift)
        params.append((w_p.astype(jnp.bfloat16), s_p))
    return params


# Pure-JAX reference mirroring the kernel's bf16-input / f32-accumulate math.
def basenet_ref(x, params):
    B, F = x.shape
    Fp = params[0][0].shape[0]
    h = jnp.zeros((B, Fp), jnp.float32).at[:, :F].set(x).astype(jnp.bfloat16)
    n = len(params)
    for i, (w, b) in enumerate(params):
        acc = jnp.dot(h, w, preferred_element_type=jnp.float32) + b
        if i < n - 1:
            h = jnp.maximum(acc, 0.0).astype(jnp.bfloat16)
        else:
            h = acc
    return h


if __name__ == "__main__":
    # Small shapes consistent with the module: batch=16, in_features=160
    # -> hidden widths 128, 96, 64, 32, output 128.
    B, in_features = 16, 160
    key = jax.random.PRNGKey(0)
    kx, kp = jax.random.split(key)
    x = jax.random.normal(kx, (B, in_features), jnp.float32)
    params = make_params(kp, in_features)

    fwd = jax.jit(functools.partial(basenet_forward, tile_b=128))
    out = jax.block_until_ready(fwd(x, params))

    ref = basenet_ref(x, params)
    assert out.shape == (B, 128), out.shape
    assert jnp.allclose(out, ref, atol=2e-2, rtol=2e-2), "mismatch vs JAX reference"

    print("KERNEL_OK")
</pallas_src>

<mosaic_0001>
module attributes {stable_mosaic.version = 11 : i64} {
  func.func @basenet_kernel(%arg0: i32, %arg1: memref<128x256xbf16, #tpu.memory_space<vmem>>, %arg2: memref<256x128xbf16, #tpu.memory_space<vmem>>, %arg3: memref<1x128xf32, #tpu.memory_space<vmem>>, %arg4: memref<128x128xbf16, #tpu.memory_space<vmem>>, %arg5: memref<1x128xf32, #tpu.memory_space<vmem>>, %arg6: memref<128x128xbf16, #tpu.memory_space<vmem>>, %arg7: memref<1x128xf32, #tpu.memory_space<vmem>>, %arg8: memref<128x128xbf16, #tpu.memory_space<vmem>>, %arg9: memref<1x128xf32, #tpu.memory_space<vmem>>, %arg10: memref<128x128xbf16, #tpu.memory_space<vmem>>, %arg11: memref<1x128xf32, #tpu.memory_space<vmem>>, %arg12: memref<128x128xf32, #tpu.memory_space<vmem>>) attributes {dimension_semantics = [#tpu.dimension_semantics<parallel>], iteration_bounds = array<i64: 1>, scalar_prefetch = 0 : i64, scratch_operands = 0 : i64, tpu.core_type = #tpu.core_type<tc>, window_params = [{transform_indices = @transform_0, window_bounds = array<i64: 128, 256>}, {pipeline_mode = #tpu.pipeline_mode<synchronous>, transform_indices = @transform_1, window_bounds = array<i64: 256, 128>}, {pipeline_mode = #tpu.pipeline_mode<synchronous>, transform_indices = @transform_2, window_bounds = array<i64: 1, 128>}, {pipeline_mode = #tpu.pipeline_mode<synchronous>, transform_indices = @transform_3, window_bounds = array<i64: 128, 128>}, {pipeline_mode = #tpu.pipeline_mode<synchronous>, transform_indices = @transform_4, window_bounds = array<i64: 1, 128>}, {pipeline_mode = #tpu.pipeline_mode<synchronous>, transform_indices = @transform_5, window_bounds = array<i64: 128, 128>}, {pipeline_mode = #tpu.pipeline_mode<synchronous>, transform_indices = @transform_6, window_bounds = array<i64: 1, 128>}, {pipeline_mode = #tpu.pipeline_mode<synchronous>, transform_indices = @transform_7, window_bounds = array<i64: 128, 128>}, {pipeline_mode = #tpu.pipeline_mode<synchronous>, transform_indices = @transform_8, window_bounds = array<i64: 1, 128>}, {pipeline_mode = #tpu.pipeline_mode<synchronous>, transform_indices = @transform_9, window_bounds = array<i64: 128, 128>}, {pipeline_mode = #tpu.pipeline_mode<synchronous>, transform_indices = @transform_10, window_bounds = array<i64: 1, 128>}, {transform_indices = @transform_11, window_bounds = array<i64: 128, 128>}]} {
    %c0 = arith.constant 0 : index
    %c0_0 = arith.constant 0 : index
    %0 = vector.load %arg1[%c0, %c0_0] : memref<128x256xbf16, #tpu.memory_space<vmem>>, vector<128x256xbf16>
    %c0_1 = arith.constant 0 : index
    %c0_2 = arith.constant 0 : index
    %1 = vector.load %arg2[%c0_1, %c0_2] : memref<256x128xbf16, #tpu.memory_space<vmem>>, vector<256x128xbf16>
    %cst = arith.constant dense<0.000000e+00> : vector<128x128xf32>
    %2 = tpu.matmul %0, %1, %cst {dimension_numbers = #tpu.dot_dimension_numbers<[1], [0], [0], [1], [0, 0, 1, 1], [], []>} : vector<128x256xbf16>, vector<256x128xbf16>, vector<128x128xf32> -> vector<128x128xf32>
    %c0_3 = arith.constant 0 : index
    %c0_4 = arith.constant 0 : index
    %3 = vector.load %arg3[%c0_3, %c0_4] : memref<1x128xf32, #tpu.memory_space<vmem>>, vector<1x128xf32>
    %4 = vector.broadcast %3 : vector<1x128xf32> to vector<128x128xf32>
    %5 = arith.addf %2, %4 : vector<128x128xf32>
    %cst_5 = arith.constant 0.000000e+00 : f32
    %6 = vector.broadcast %cst_5 : f32 to vector<128x128xf32>
    %7 = arith.maximumf %5, %6 : vector<128x128xf32>
    %8 = arith.truncf %7 : vector<128x128xf32> to vector<128x128xbf16>
    %c0_6 = arith.constant 0 : index
    %c0_7 = arith.constant 0 : index
    %9 = vector.load %arg4[%c0_6, %c0_7] : memref<128x128xbf16, #tpu.memory_space<vmem>>, vector<128x128xbf16>
    %cst_8 = arith.constant dense<0.000000e+00> : vector<128x128xf32>
    %10 = tpu.matmul %8, %9, %cst_8 {dimension_numbers = #tpu.dot_dimension_numbers<[1], [0], [0], [1], [0, 0, 1, 1], [], []>} : vector<128x128xbf16>, vector<128x128xbf16>, vector<128x128xf32> -> vector<128x128xf32>
    %c0_9 = arith.constant 0 : index
    %c0_10 = arith.constant 0 : index
    %11 = vector.load %arg5[%c0_9, %c0_10] : memref<1x128xf32, #tpu.memory_space<vmem>>, vector<1x128xf32>
    %12 = vector.broadcast %11 : vector<1x128xf32> to vector<128x128xf32>
    %13 = arith.addf %10, %12 : vector<128x128xf32>
    %cst_11 = arith.constant 0.000000e+00 : f32
    %14 = vector.broadcast %cst_11 : f32 to vector<128x128xf32>
    %15 = arith.maximumf %13, %14 : vector<128x128xf32>
    %16 = arith.truncf %15 : vector<128x128xf32> to vector<128x128xbf16>
    %c0_12 = arith.constant 0 : index
    %c0_13 = arith.constant 0 : index
    %17 = vector.load %arg6[%c0_12, %c0_13] : memref<128x128xbf16, #tpu.memory_space<vmem>>, vector<128x128xbf16>
    %cst_14 = arith.constant dense<0.000000e+00> : vector<128x128xf32>
    %18 = tpu.matmul %16, %17, %cst_14 {dimension_numbers = #tpu.dot_dimension_numbers<[1], [0], [0], [1], [0, 0, 1, 1], [], []>} : vector<128x128xbf16>, vector<128x128xbf16>, vector<128x128xf32> -> vector<128x128xf32>
    %c0_15 = arith.constant 0 : index
    %c0_16 = arith.constant 0 : index
    %19 = vector.load %arg7[%c0_15, %c0_16] : memref<1x128xf32, #tpu.memory_space<vmem>>, vector<1x128xf32>
    %20 = vector.broadcast %19 : vector<1x128xf32> to vector<128x128xf32>
    %21 = arith.addf %18, %20 : vector<128x128xf32>
    %cst_17 = arith.constant 0.000000e+00 : f32
    %22 = vector.broadcast %cst_17 : f32 to vector<128x128xf32>
    %23 = arith.maximumf %21, %22 : vector<128x128xf32>
    %24 = arith.truncf %23 : vector<128x128xf32> to vector<128x128xbf16>
    %c0_18 = arith.constant 0 : index
    %c0_19 = arith.constant 0 : index
    %25 = vector.load %arg8[%c0_18, %c0_19] : memref<128x128xbf16, #tpu.memory_space<vmem>>, vector<128x128xbf16>
    %cst_20 = arith.constant dense<0.000000e+00> : vector<128x128xf32>
    %26 = tpu.matmul %24, %25, %cst_20 {dimension_numbers = #tpu.dot_dimension_numbers<[1], [0], [0], [1], [0, 0, 1, 1], [], []>} : vector<128x128xbf16>, vector<128x128xbf16>, vector<128x128xf32> -> vector<128x128xf32>
    %c0_21 = arith.constant 0 : index
    %c0_22 = arith.constant 0 : index
    %27 = vector.load %arg9[%c0_21, %c0_22] : memref<1x128xf32, #tpu.memory_space<vmem>>, vector<1x128xf32>
    %28 = vector.broadcast %27 : vector<1x128xf32> to vector<128x128xf32>
    %29 = arith.addf %26, %28 : vector<128x128xf32>
    %cst_23 = arith.constant 0.000000e+00 : f32
    %30 = vector.broadcast %cst_23 : f32 to vector<128x128xf32>
    %31 = arith.maximumf %29, %30 : vector<128x128xf32>
    %32 = arith.truncf %31 : vector<128x128xf32> to vector<128x128xbf16>
    %c0_24 = arith.constant 0 : index
    %c0_25 = arith.constant 0 : index
    %33 = vector.load %arg10[%c0_24, %c0_25] : memref<128x128xbf16, #tpu.memory_space<vmem>>, vector<128x128xbf16>
    %cst_26 = arith.constant dense<0.000000e+00> : vector<128x128xf32>
    %34 = tpu.matmul %32, %33, %cst_26 {dimension_numbers = #tpu.dot_dimension_numbers<[1], [0], [0], [1], [0, 0, 1, 1], [], []>} : vector<128x128xbf16>, vector<128x128xbf16>, vector<128x128xf32> -> vector<128x128xf32>
    %c0_27 = arith.constant 0 : index
    %c0_28 = arith.constant 0 : index
    %35 = vector.load %arg11[%c0_27, %c0_28] : memref<1x128xf32, #tpu.memory_space<vmem>>, vector<1x128xf32>
    %36 = vector.broadcast %35 : vector<1x128xf32> to vector<128x128xf32>
    %37 = arith.addf %34, %36 : vector<128x128xf32>
    %c0_29 = arith.constant 0 : index
    %c0_30 = arith.constant 0 : index
    %38 = vector.load %arg12[%c0_29, %c0_30] : memref<128x128xf32, #tpu.memory_space<vmem>>, vector<128x128xf32>
    tpu.vector_store %arg12[%c0_29, %c0_30], %37 {strides = array<i32>} : memref<128x128xf32, #tpu.memory_space<vmem>>, vector<128x128xf32>,
    return
  }
  func.func @transform_0(%arg0: i32) -> (i32, i32) {
    %c0_i32 = arith.constant 0 : i32
    %c0_i32_0 = arith.constant 0 : i32
    return %arg0, %c0_i32 : i32, i32
  }
  func.func @transform_1(%arg0: i32) -> (i32, i32) {
    %c0_i32 = arith.constant 0 : i32
    %c0_i32_0 = arith.constant 0 : i32
    %c0_i32_1 = arith.constant 0 : i32
    return %c0_i32, %c0_i32_0 : i32, i32
  }
  func.func @transform_2(%arg0: i32) -> (i32, i32) {
    %c0_i32 = arith.constant 0 : i32
    %c0_i32_0 = arith.constant 0 : i32
    %c0_i32_1 = arith.constant 0 : i32
    return %c0_i32, %c0_i32_0 : i32, i32
  }
  func.func @transform_3(%arg0: i32) -> (i32, i32) {
    %c0_i32 = arith.constant 0 : i32
    %c0_i32_0 = arith.constant 0 : i32
    %c0_i32_1 = arith.constant 0 : i32
    return %c0_i32, %c0_i32_0 : i32, i32
  }
  func.func @transform_4(%arg0: i32) -> (i32, i32) {
    %c0_i32 = arith.constant 0 : i32
    %c0_i32_0 = arith.constant 0 : i32
    %c0_i32_1 = arith.constant 0 : i32
    return %c0_i32, %c0_i32_0 : i32, i32
  }
  func.func @transform_5(%arg0: i32) -> (i32, i32) {
    %c0_i32 = arith.constant 0 : i32
    %c0_i32_0 = arith.constant 0 : i32
    %c0_i32_1 = arith.constant 0 : i32
    return %c0_i32, %c0_i32_0 : i32, i32
  }
  func.func @transform_6(%arg0: i32) -> (i32, i32) {
    %c0_i32 = arith.constant 0 : i32
    %c0_i32_0 = arith.constant 0 : i32
    %c0_i32_1 = arith.constant 0 : i32
    return %c0_i32, %c0_i32_0 : i32, i32
  }
  func.func @transform_7(%arg0: i32) -> (i32, i32) {
    %c0_i32 = arith.constant 0 : i32
    %c0_i32_0 = arith.constant 0 : i32
    %c0_i32_1 = arith.constant 0 : i32
    return %c0_i32, %c0_i32_0 : i32, i32
  }
  func.func @transform_8(%arg0: i32) -> (i32, i32) {
    %c0_i32 = arith.constant 0 : i32
    %c0_i32_0 = arith.constant 0 : i32
    %c0_i32_1 = arith.constant 0 : i32
    return %c0_i32, %c0_i32_0 : i32, i32
  }
  func.func @transform_9(%arg0: i32) -> (i32, i32) {
    %c0_i32 = arith.constant 0 : i32
    %c0_i32_0 = arith.constant 0 : i32
    %c0_i32_1 = arith.constant 0 : i32
    return %c0_i32, %c0_i32_0 : i32, i32
  }
  func.func @transform_10(%arg0: i32) -> (i32, i32) {
    %c0_i32 = arith.constant 0 : i32
    %c0_i32_0 = arith.constant 0 : i32
    %c0_i32_1 = arith.constant 0 : i32
    return %c0_i32, %c0_i32_0 : i32, i32
  }
  func.func @transform_11(%arg0: i32) -> (i32, i32) {
    %c0_i32 = arith.constant 0 : i32
    %c0_i32_0 = arith.constant 0 : i32
    return %arg0, %c0_i32 : i32, i32
  }
}

</mosaic_0001>

<bundles_post_ra>
// kernel: basenet_forward.1
= control target key start
LH: loop header
LB: loop body
LE: loop exit
PB: predicated region body
PF: predicated region fallthrough
CT: control target
= control target key end

     0   :  { %16 = vsyncpa [#allocation3], 0  ;;  %s1988_s0 = inlined_call_operand.vmem [shape: bf16[128,256], index: 0, kind: input, shape index: {}]   ;;  %s1989_s1 = inlined_call_operand.vmem [shape: bf16[256,128], index: 1, kind: input, shape index: {}]   ;;  %s1990_s2 = inlined_call_operand.vmem [shape: f32[1,128], index: 2, kind: input, shape index: {}]   ;;  %s1991_s3 = inlined_call_operand.vmem [shape: bf16[128,128], index: 3, kind: input, shape index: {}]   ;;  %s1992_s4 = inlined_call_operand.vmem [shape: f32[1,128], index: 4, kind: input, shape index: {}]   ;;  %s1993_s5 = inlined_call_operand.hbm [shape: bf16[128,128], index: 5, kind: input, shape index: {}]   ;;  %s1994_s6 = inlined_call_operand.vmem [shape: f32[1,128], index: 6, kind: input, shape index: {}]   ;;  %s1995_s7 = inlined_call_operand.hbm [shape: bf16[128,128], index: 7, kind: input, shape index: {}]   ;;  %s1996_s8 = inlined_call_operand.vmem [shape: f32[1,128], index: 8, kind: input, shape index: {}]   ;;  %s1997_s9 = inlined_call_operand.hbm [shape: bf16[128,128], index: 9, kind: input, shape index: {}]   ;;  %s1998_s10 = inlined_call_operand.vmem [shape: f32[1,128], index: 10, kind: input, shape index: {}]   ;;  %s1999_s11 = inlined_call_operand.vmem [shape: f32[128,128], index: 11, kind: output, shape index: {}]  }
   0x1   :  { %17 = vsyncpa [#allocation5], 0  ;;  %s1670_s17 = smov [#allocation4]   ;;  %s1671_s19 = smov [#allocation2]  }
   0x2   :  { %s47_s18 = sshll.u32 %s1670_s17, 4  ;;  %s33_s20 = sshll.u32 %s1671_s19, 4  ;;  %s48_s18 = int_to_ptr.vmem [resolvable:$true] %s47_s18  ;;  %s1735_s20 = int_to_ptr.vmem [resolvable:$true] %s33_s20 }
   0x3   :  { %s1600_s23 = scalar_lea.hbm %s1995_s7, 1024 }
   0x4   :  { %p1601_p0 = scmp.ne.s32.totalorder %s1995_s7, %s1600_s23  ;;  %p1604_p1 = scmp.lt.u32.totalorder %s1600_s23, %s1995_s7 }
   0x6   :  { %p1606_p2 = pnand %p1604_p1, %p1601_p0 }
   0x8   :  { %1609 = shalt.err (!%p1606_p2)
}
   0x9   :  { %s1610_s28 = scalar_lea.vmem %s48_s18, 1024  ;;  %p1615_p4 = scmp.lt.s32.totalorder %s48_s18, %s48_s18 }
   0xa   :  { %p1611_p3 = scmp.ne.s32.totalorder %s48_s18, %s1610_s28  ;;  %p1616_p5 = scmp.lt.s32.totalorder %s1610_s28, %s1610_s28 }
   0xc   :  { %p1617_p6 = por %p1616_p5, %p1615_p4 }
   0xe   :  { %p1618_p7 = pnand %p1617_p6, %p1611_p3 }
  0x10   :  { %1621 = shalt.err (!%p1618_p7)
}
  0x11   :  { %s1672_s29 = smov 64   ;;  %s1673_s30 = smov 4  }
  0x12   :  { %53 = dma.hbm_to_vmem [thread:$0]  %s1995_s7, 1024, %s48_s18, [#allocation5], %s1672_s29, %s1672_s29, %s1673_s30  }
  0x13   :  { %s1622_s16 = scalar_lea.hbm %s1993_s5, 1024 }
  0x14   :  { %p1623_p8 = scmp.ne.s32.totalorder %s1993_s5, %s1622_s16  ;;  %p1626_p9 = scmp.lt.u32.totalorder %s1622_s16, %s1993_s5 }
  0x16   :  { %p1628_p10 = pnand %p1626_p9, %p1623_p8 }
  0x18   :  { %1631 = shalt.err (!%p1628_p10)
}
  0x19   :  { %s1632_s23 = scalar_lea.vmem %s1735_s20, 1024  ;;  %p1637_p12 = scmp.lt.s32.totalorder %s1735_s20, %s1735_s20 }
  0x1a   :  { %p1633_p11 = scmp.ne.s32.totalorder %s1735_s20, %s1632_s23  ;;  %p1638_p13 = scmp.lt.s32.totalorder %s1632_s23, %s1632_s23 }
  0x1c   :  { %p1639_p0 = por %p1638_p13, %p1637_p12 }
  0x1e   :  { %p1640_p1 = pnand %p1639_p0, %p1633_p11 }
  0x20   :  { %1643 = shalt.err (!%p1640_p1)
}
  0x21   :  { %39 = dma.hbm_to_vmem [thread:$0]  %s1993_s5, 1024, %s1735_s20, [#allocation3], %s1672_s29, %s1672_s29, %s1673_s30  }
  0x22   :  { %s1674_s24 = smov [#allocation6]   ;;  %s1644_s28 = scalar_lea.hbm %s1997_s9, 1024 }
  0x23   :  { %s61_s25 = sshll.u32 %s1674_s24, 4  ;;  %p1645_p2 = scmp.ne.s32.totalorder %s1997_s9, %s1644_s28  ;;  %s62_s25 = int_to_ptr.vmem [resolvable:$true] %s61_s25 }
  0x24   :  { %p1648_p3 = scmp.lt.u32.totalorder %s1644_s28, %s1997_s9 }
  0x26   :  { %p1650_p4 = pnand %p1648_p3, %p1645_p2 }
  0x28   :  { %1653 = shalt.err (!%p1650_p4)
}
  0x29   :  { %s1654_s16 = scalar_lea.vmem %s62_s25, 1024  ;;  %p1659_p6 = scmp.lt.s32.totalorder %s62_s25, %s62_s25 }
  0x2a   :  { %p1655_p5 = scmp.ne.s32.totalorder %s62_s25, %s1654_s16  ;;  %p1660_p7 = scmp.lt.s32.totalorder %s1654_s16, %s1654_s16 }
  0x2c   :  { %p1661_p8 = por %p1660_p7, %p1659_p6 }
  0x2e   :  { %p1662_p9 = pnand %p1661_p8, %p1655_p5 }
  0x30   :  { %1665 = shalt.err (!%p1662_p9)
}
  0x31   :  { %67 = dma.hbm_to_vmem [thread:$0]  %s1997_s9, 1024, %s62_s25, [#allocation5], %s1672_s29, %s1672_s29, %s1673_s30  }
  0x32   :  { %1666 = dma.done.wait [#allocation3], 1024  }
  0x33   :  { %1667 = vsyncadd [#allocation3], 4294966272 }
  0x34   :  { %1668 = dma.done.wait [#allocation5], 2048  }
  0x35   :  { %1669 = vsyncadd [#allocation5], 4294965248  ;;  %v1528_v0 = vld [vmem:[%s1989_s1 + $0x40] sm:$0xff]   ;;  %v1530_v2 = vld [vmem:[%s1989_s1 + $0x48] sm:$0xff]  }
  0x36   :  { %v1529_v1 = vld [vmem:[%s1989_s1] sm:$0xff]   ;;  %1267 = vmatprep.subr.bf16.mxu0 %v1528_v0  ;;  %v1531_v3 = vld [vmem:[%s1989_s1 + $0x8] sm:$0xff]   ;;  %v1532_v4 = vld [vmem:[%s1989_s1 + $0x50] sm:$0xff]  }
  0x37   :  { %1268 = vmatpush3.bf16.msra.mxu0 %v1529_v1  ;;  %v1533_v5 = vld [vmem:[%s1989_s1 + $0x10] sm:$0xff]   ;;  %v1534_v6 = vld [vmem:[%s1989_s1 + $0x58] sm:$0xff]   ;;  %v1536_v8 = vld [vmem:[%s1989_s1 + $0x60] sm:$0xff]  }
  0x38   :  { %1269 = vmatprep.subr.bf16.mxu0 %v1530_v2  ;;  %v1535_v7 = vld [vmem:[%s1989_s1 + $0x18] sm:$0xff]   ;;  %v1537_v9 = vld [vmem:[%s1989_s1 + $0x20] sm:$0xff]   ;;  %v1538_v10 = vld [vmem:[%s1989_s1 + $0x68] sm:$0xff]  }
  0x39   :  { %v1546_v11 = vld [vmem:[%s1988_s0 + $0x4] ss:$8 sps:$4 sm:$0xff]   ;;  %v1540_v13 = vld [vmem:[%s1989_s1 + $0x70] sm:$0xff]   ;;  %v1542_v15 = vld [vmem:[%s1989_s1 + $0x78] sm:$0xff]  }
  0x3a   :  { %v1539_v12 = vld [vmem:[%s1989_s1 + $0x28] sm:$0xff]   ;;  %343 = vmatprep.mubr.bf16.mxu0 %v1546_v11  ;;  %v1541_v14 = vld [vmem:[%s1989_s1 + $0x30] sm:$0xff]   ;;  %v1543_v16 = vld [vmem:[%s1989_s1 + $0x38] sm:$0xff]  }
  0x3b   :  { %1270 = vmatpush3.bf16.msra.mxu0 %v1531_v3  ;;  %v1568_v17 = vld [vmem:[%s1991_s3] sm:$0xff]   ;;  %v1569_v19 = vld [vmem:[%s1991_s3 + $0x8] sm:$0xff]   ;;  %v1547_v20 = vld [vmem:[%s1988_s0 + $0x14] ss:$8 sps:$4 sm:$0xff]  }
  0x3c   :  { %1271 = vmatprep.subr.bf16.mxu0 %v1532_v4  ;;  %v1544_v18 = vld [vmem:[%s1988_s0] ss:$8 sps:$4 sm:$0xff]   ;;  %1395 = vmatprep.subr.bf16.mxu1 %v1568_v17  ;;  %v1570_v21 = vld [vmem:[%s1991_s3 + $0x10] sm:$0xff]   ;;  %v1550_v23 = vld [vmem:[%s1988_s0 + $0x24] ss:$8 sps:$4 sm:$0xff]  }
  0x3d   :  { %1396 = vmatpush3.bf16.msra.mxu1 %v1568_v17  ;;  %v1549_v22 = vld [vmem:[%s1988_s0 + $0x10] ss:$8 sps:$4 sm:$0xff]   ;;  %v1552_v24 = vld [vmem:[%s1988_s0 + $0x20] ss:$8 sps:$4 sm:$0xff]   ;;  %v1553_v25 = vld [vmem:[%s1988_s0 + $0x34] ss:$8 sps:$4 sm:$0xff]  }
  0x3e   :  { %1397 = vmatprep.subr.bf16.mxu1 %v1569_v19  ;;  %v1555_v26 = vld [vmem:[%s1988_s0 + $0x30] ss:$8 sps:$4 sm:$0xff]   ;;  %v1556_v27 = vld [vmem:[%s1988_s0 + $0x44] ss:$8 sps:$4 sm:$0xff]   ;;  %v1558_v28 = vld [vmem:[%s1988_s0 + $0x40] ss:$8 sps:$4 sm:$0xff]  }
  0x3f   :  { %1272 = vmatpush3.bf16.msra.mxu0 %v1533_v5  ;;  %v1559_v29 = vld [vmem:[%s1988_s0 + $0x54] ss:$8 sps:$4 sm:$0xff]   ;;  %v1561_v30 = vld [vmem:[%s1988_s0 + $0x50] ss:$8 sps:$4 sm:$0xff]   ;;  %v1562_v31 = vld [vmem:[%s1988_s0 + $0x64] ss:$8 sps:$4 sm:$0xff]  }
  0x40   :  { %1273 = vmatprep.subr.bf16.mxu0 %v1534_v6  ;;  %v1564_v32 = vld [vmem:[%s1988_s0 + $0x60] ss:$8 sps:$4 sm:$0xff]   ;;  %v1565_v33 = vld [vmem:[%s1988_s0 + $0x74] ss:$8 sps:$4 sm:$0xff]   ;;  %v1567_v34 = vld [vmem:[%s1988_s0 + $0x70] ss:$8 sps:$4 sm:$0xff]  }
  0x41   :  { %1398 = vmatpush3.bf16.msra.mxu1 %v1569_v19  ;;  %v1571_v35 = vld [vmem:[%s1991_s3 + $0x18] sm:$0xff]   ;;  %v1572_v36 = vld [vmem:[%s1991_s3 + $0x20] sm:$0xff]   ;;  %v1573_v37 = vld [vmem:[%s1991_s3 + $0x28] sm:$0xff]  }
  0x42   :  { %1399 = vmatprep.subr.bf16.mxu1 %v1570_v21  ;;  %v1574_v38 = vld [vmem:[%s1991_s3 + $0x30] sm:$0xff]   ;;  %v1575_v39 = vld [vmem:[%s1991_s3 + $0x38] sm:$0xff]   ;;  %v1576_v40 = vld [vmem:[#allocation2] sm:$0xff]  }
  0x43   :  { %1274 = vmatpush3.bf16.msra.mxu0 %v1535_v7  ;;  %v1910_v43 = vld [vmem:[%s1990_s2] ss:$0 sm:$0xff]  ;;  %v1577_v4 = vld [vmem:[#allocation2 + $0x8] sm:$0xff]   ;;  %v1579_v17 = vld [vmem:[#allocation2 + $0x18] sm:$0xff]  }
  0x44   :  { %1275 = vmatprep.subr.bf16.mxu0 %v1536_v8 }
  0x45   :  { %1400 = vmatpush3.bf16.msra.mxu1 %v1570_v21 }
  0x46   :  { %1401 = vmatprep.subr.bf16.mxu1 %v1571_v35 }
  0x47   :  { %1276 = vmatpush3.bf16.msra.mxu0 %v1537_v9  ;;  %v1578_v9 = vld [vmem:[#allocation2 + $0x10] sm:$0xff]  }
  0x48   :  { %1277 = vmatprep.subr.bf16.mxu0 %v1538_v10 }
  0x49   :  { %1402 = vmatpush3.bf16.msra.mxu1 %v1571_v35 }
  0x4a   :  { %1403 = vmatprep.subr.bf16.mxu1 %v1572_v36 }
  0x4b   :  { %1278 = vmatpush3.bf16.msra.mxu0 %v1539_v12 }
  0x4c   :  { %1279 = vmatprep.subr.bf16.mxu0 %v1540_v13 }
  0x4d   :  { %1404 = vmatpush3.bf16.msra.mxu1 %v1572_v36 }
  0x4e   :  { %1405 = vmatprep.subr.bf16.mxu1 %v1573_v37 }
  0x4f   :  { %1280 = vmatpush3.bf16.msra.mxu0 %v1541_v14 }
  0x50   :  { %1281 = vmatprep.subr.bf16.mxu0 %v1542_v15 }
  0x51   :  { %1406 = vmatpush3.bf16.msra.mxu1 %v1573_v37 }
  0x52   :  { %1407 = vmatprep.subr.bf16.mxu1 %v1574_v38 }
  0x53   :  { %1282 = vmatpush3.bf16.msra.mxu0 %v1543_v16 }
  0x55   :  { %1408 = vmatpush3.bf16.msra.mxu1 %v1574_v38 }
  0x56   :  { %344 = vmatmul.mubr.bf16.vlgmr.msra.gmra.mrb[0].mxu0 %v1544_v18  ;;  %1409 = vmatprep.subr.bf16.mxu1 %v1575_v39 }
  0x57   :  { %351 = vmatprep.mubr.bf16.mxu0 %v1547_v20 }
  0x59   :  { %1410 = vmatpush3.bf16.msra.mxu1 %v1575_v39 }
  0x5a   :  { %1427 = vmatprep.subr.bf16.mxu1 %v1576_v40 }
  0x5e   :  { %352 = vmatmul.mubr.bf16.gmra.mrb[4].mxu0 %v1549_v22  ;;  %v1580_v22 = vld [vmem:[#allocation2 + $0x20] sm:$0xff]  }
  0x5f   :  { %359 = vmatprep.mubr.bf16.mxu0 %v1550_v23 }
  0x66   :  { %360 = vmatmul.mubr.bf16.gmra.mrb[8].mxu0 %v1552_v24 }
  0x67   :  { %367 = vmatprep.mubr.bf16.mxu0 %v1553_v25 }
  0x6e   :  { %368 = vmatmul.mubr.bf16.gmra.mrb[12].mxu0 %v1555_v26 }
  0x6f   :  { %375 = vmatprep.mubr.bf16.mxu0 %v1556_v27 }
  0x76   :  { %376 = vmatmul.mubr.bf16.gmra.mrb[16].mxu0 %v1558_v28 }
  0x77   :  { %383 = vmatprep.mubr.bf16.mxu0 %v1559_v29 }
  0x7e   :  { %384 = vmatmul.mubr.bf16.gmra.mrb[20].mxu0 %v1561_v30  ;;  %v1581_v30 = vld [vmem:[#allocation2 + $0x28] sm:$0xff]  }
  0x7f   :  { %391 = vmatprep.mubr.bf16.mxu0 %v1562_v31 }
  0x86   :  { %392 = vmatmul.mubr.bf16.gmra.mrb[24].mxu0 %v1564_v32 }
  0x87   :  { %399 = vmatprep.mubr.bf16.mxu0 %v1565_v33 }
  0x8e   :  { %400 = vmatmul.mubr.bf16.gmra.mrb[28].mxu0 %v1567_v34 }
 0x129   :  { %v1283_v41 = vpop.f32.mrb[0].mxu0 }
 0x12a   :  { %v1284_v42 = vpop.f32.mrb[1].mxu0 }
 0x12b   :  { %v1285_v44 = vadd.f32 %v1284_v42, %v1283_v41  ;;  %v1286_v45 = vpop.f32.mrb[2].mxu0 }
 0x12c   :  { %v1287_v46 = vpop.f32.mrb[3].mxu0 }
 0x12d   :  { %v1288_v47 = vadd.f32 %v1287_v46, %v1286_v45  ;;  %v346_v48 = vadd.f32 %v1285_v44, %v1910_v43 }
 0x12f   :  { %v349_v49 = vadd.f32 %v1288_v47, %v1910_v43  ;;  %v408_v51 = vmax.f32 %v346_v48, 0.0 }
 0x131   :  { %v1289_v50 = vpop.f32.mrb[4].mxu0  ;;  %v409_v52 = vmax.f32 %v349_v49, 0.0 }
 0x132   :  { %v1290_v53 = vpop.f32.mrb[5].mxu0 }
 0x133   :  { %v1291_v54 = vadd.f32 %v1290_v53, %v1289_v50  ;;  %v1292_v55 = vpop.f32.mrb[6].mxu0  ;;  %v424_v56 = vpack.c.bf16 %v409_v52, %v408_v51 }
 0x134   :  { %v1293_v57 = vpop.f32.mrb[7].mxu0 }
 0x135   :  { %v354_v58 = vadd.f32 %v1291_v54, %v1910_v43  ;;  %v1294_v59 = vadd.f32 %v1293_v57, %v1292_v55  ;;  %1411 = vmatprep.mubr.bf16.mxu1 %v424_v56 }
 0x137   :  { %v357_v60 = vadd.f32 %v1294_v59, %v1910_v43  ;;  %v410_v61 = vmax.f32 %v354_v58, 0.0 }
 0x139   :  { %v411_v62 = vmax.f32 %v357_v60, 0.0  ;;  %v1295_v63 = vpop.f32.mrb[8].mxu0 }
 0x13a   :  { %v1296_v0 = vpop.f32.mrb[9].mxu0 }
 0x13b   :  { %v1297_v1 = vadd.f32 %v1296_v0, %v1295_v63  ;;  %v1298_v2 = vpop.f32.mrb[10].mxu0  ;;  %v425_v3 = vpack.c.bf16 %v411_v62, %v410_v61 }
 0x13c   :  { %v1299_v5 = vpop.f32.mrb[11].mxu0 }
 0x13d   :  { %v362_v6 = vadd.f32 %v1297_v1, %v1910_v43  ;;  %v1300_v7 = vadd.f32 %v1299_v5, %v1298_v2  ;;  %1412 = vmatmul.mubr.bf16.vlgmr.msra.gmra.mrb[0].mxu1 %v425_v3 }
 0x13e   :  { %1428 = vmatpush3.bf16.msra.mxu1 %v1576_v40 }
 0x13f   :  { %v365_v8 = vadd.f32 %v1300_v7, %v1910_v43  ;;  %1429 = vmatprep.subr.bf16.mxu1 %v1577_v4  ;;  %v412_v10 = vmax.f32 %v362_v6, 0.0 }
 0x141   :  { %v413_v11 = vmax.f32 %v365_v8, 0.0  ;;  %v1301_v12 = vpop.f32.mrb[12].mxu0  ;;  %v1582_v8 = vld [vmem:[#allocation2 + $0x30] sm:$0xff]  }
 0x142   :  { %v1302_v13 = vpop.f32.mrb[13].mxu0  ;;  %1430 = vmatpush3.bf16.msra.mxu1 %v1577_v4 }
 0x143   :  { %v1303_v14 = vadd.f32 %v1302_v13, %v1301_v12  ;;  %v1304_v15 = vpop.f32.mrb[14].mxu0  ;;  %v426_v16 = vpack.c.bf16 %v413_v11, %v412_v10  ;;  %1431 = vmatprep.subr.bf16.mxu1 %v1578_v9  ;;  %v1584_v10 = vld [vmem:[#allocation4] sm:$0xff]   ;;  %v1585_v11 = vld [vmem:[#allocation4 + $0x8] sm:$0xff]   ;;  %v1586_v12 = vld [vmem:[#allocation4 + $0x10] sm:$0xff]  }
 0x144   :  { %v1305_v18 = vpop.f32.mrb[15].mxu0  ;;  %1459 = vmatprep.subr.bf16.mxu0 %v1584_v10  ;;  %v1587_v13 = vld [vmem:[#allocation4 + $0x18] sm:$0xff]  }
 0x145   :  { %v370_v19 = vadd.f32 %v1303_v14, %v1910_v43  ;;  %v1306_v20 = vadd.f32 %v1305_v18, %v1304_v15  ;;  %1415 = vmatprep.mubr.bf16.mxu1 %v426_v16  ;;  %1460 = vmatpush3.bf16.msra.mxu0 %v1584_v10  ;;  %v1589_v14 = vld [vmem:[#allocation4 + $0x28] sm:$0xff]   ;;  %v1231_v15 = vld [vmem:[%s1992_s4] ss:$0 sm:$0xff]  ;;  %v1591_v10 = vld [vmem:[#allocation4 + $0x38] sm:$0xff]  }
 0x146   :  { %1432 = vmatpush3.bf16.msra.mxu1 %v1578_v9  ;;  %v1583_v9 = vld [vmem:[#allocation2 + $0x38] sm:$0xff]   ;;  %1461 = vmatprep.subr.bf16.mxu0 %v1585_v11 }
 0x147   :  { %v373_v21 = vadd.f32 %v1306_v20, %v1910_v43  ;;  %1433 = vmatprep.subr.bf16.mxu1 %v1579_v17  ;;  %v414_v23 = vmax.f32 %v370_v19, 0.0 }
 0x149   :  { %v415_v24 = vmax.f32 %v373_v21, 0.0  ;;  %v1307_v25 = vpop.f32.mrb[16].mxu0  ;;  %1462 = vmatpush3.bf16.msra.mxu0 %v1585_v11  ;;  %v1592_v11 = vld [vmem:[#allocation6] sm:$0xff]  }
 0x14a   :  { %v1308_v26 = vpop.f32.mrb[17].mxu0  ;;  %1434 = vmatpush3.bf16.msra.mxu1 %v1579_v17  ;;  %1463 = vmatprep.subr.bf16.mxu0 %v1586_v12 }
 0x14b   :  { %v1309_v27 = vadd.f32 %v1308_v26, %v1307_v25  ;;  %v1310_v28 = vpop.f32.mrb[18].mxu0  ;;  %v427_v29 = vpack.c.bf16 %v415_v24, %v414_v23  ;;  %1435 = vmatprep.subr.bf16.mxu1 %v1580_v22 }
 0x14c   :  { %v1311_v31 = vpop.f32.mrb[19].mxu0 }
 0x14d   :  { %v378_v32 = vadd.f32 %v1309_v27, %v1910_v43  ;;  %v1312_v33 = vadd.f32 %v1311_v31, %v1310_v28  ;;  %1416 = vmatmul.mubr.bf16.gmra.mrb[4].mxu1 %v427_v29  ;;  %1464 = vmatpush3.bf16.msra.mxu0 %v1586_v12  ;;  %v1593_v12 = vld [vmem:[#allocation6 + $0x8] sm:$0xff]  }
 0x14e   :  { %1436 = vmatpush3.bf16.msra.mxu1 %v1580_v22  ;;  %1465 = vmatprep.subr.bf16.mxu0 %v1587_v13 }
 0x14f   :  { %v381_v34 = vadd.f32 %v1312_v33, %v1910_v43  ;;  %1437 = vmatprep.subr.bf16.mxu1 %v1581_v30  ;;  %v416_v35 = vmax.f32 %v378_v32, 0.0 }
 0x151   :  { %v417_v36 = vmax.f32 %v381_v34, 0.0  ;;  %v1313_v37 = vpop.f32.mrb[20].mxu0  ;;  %1466 = vmatpush3.bf16.msra.mxu0 %v1587_v13  ;;  %v1594_v13 = vld [vmem:[#allocation6 + $0x10] sm:$0xff]  }
 0x152   :  { %v1314_v38 = vpop.f32.mrb[21].mxu0  ;;  %1438 = vmatpush3.bf16.msra.mxu1 %v1581_v30 }
 0x153   :  { %v1315_v39 = vadd.f32 %v1314_v38, %v1313_v37  ;;  %v1316_v40 = vpop.f32.mrb[22].mxu0  ;;  %v428_v41 = vpack.c.bf16 %v417_v36, %v416_v35  ;;  %1439 = vmatprep.subr.bf16.mxu1 %v1582_v8 }
 0x154   :  { %v1317_v42 = vpop.f32.mrb[23].mxu0 }
 0x155   :  { %v386_v44 = vadd.f32 %v1315_v39, %v1910_v43  ;;  %v1318_v45 = vadd.f32 %v1317_v42, %v1316_v40  ;;  %1419 = vmatprep.mubr.bf16.mxu1 %v428_v41 }
 0x156   :  { %1440 = vmatpush3.bf16.msra.mxu1 %v1582_v8 }
 0x157   :  { %v389_v46 = vadd.f32 %v1318_v45, %v1910_v43  ;;  %v418_v47 = vmax.f32 %v386_v44, 0.0  ;;  %1441 = vmatprep.subr.bf16.mxu1 %v1583_v9 }
 0x159   :  { %v419_v48 = vmax.f32 %v389_v46, 0.0  ;;  %v1319_v49 = vpop.f32.mrb[24].mxu0 }
 0x15a   :  { %v1320_v50 = vpop.f32.mrb[25].mxu0  ;;  %1442 = vmatpush3.bf16.msra.mxu1 %v1583_v9  ;;  %v1590_v9 = vld [vmem:[#allocation4 + $0x30] sm:$0xff]  }
 0x15b   :  { %v1321_v51 = vadd.f32 %v1320_v50, %v1319_v49  ;;  %v1322_v52 = vpop.f32.mrb[26].mxu0  ;;  %v429_v53 = vpack.c.bf16 %v419_v48, %v418_v47  ;;  %1491 = vmatprep.subr.bf16.mxu1 %v1592_v11 }
 0x15c   :  { %v1323_v54 = vpop.f32.mrb[27].mxu0 }
 0x15d   :  { %v394_v55 = vadd.f32 %v1321_v51, %v1910_v43  ;;  %v1324_v56 = vadd.f32 %v1323_v54, %v1322_v52  ;;  %1420 = vmatmul.mubr.bf16.gmra.mrb[8].mxu1 %v429_v53 }
 0x15f   :  { %v397_v57 = vadd.f32 %v1324_v56, %v1910_v43  ;;  %v420_v58 = vmax.f32 %v394_v55, 0.0 }
 0x161   :  { %v421_v59 = vmax.f32 %v397_v57, 0.0  ;;  %v1325_v60 = vpop.f32.mrb[28].mxu0 }
 0x162   :  { %v1326_v61 = vpop.f32.mrb[29].mxu0 }
 0x163   :  { %v1327_v62 = vadd.f32 %v1326_v61, %v1325_v60  ;;  %v1328_v63 = vpop.f32.mrb[30].mxu0  ;;  %v430_v0 = vpack.c.bf16 %v421_v59, %v420_v58 }
 0x164   :  { %v1329_v1 = vpop.f32.mrb[31].mxu0 }
 0x165   :  { %v402_v2 = vadd.f32 %v1327_v62, %v1910_v43  ;;  %v1330_v3 = vadd.f32 %v1329_v1, %v1328_v63  ;;  %1423 = vmatprep.mubr.bf16.mxu1 %v430_v0 }
 0x167   :  { %v405_v4 = vadd.f32 %v1330_v3, %v1910_v43  ;;  %v422_v5 = vmax.f32 %v402_v2, 0.0  ;;  %v1588_v43 = vld [vmem:[#allocation4 + $0x20] sm:$0xff]  }
 0x168   :  { %1467 = vmatprep.subr.bf16.mxu0 %v1588_v43 }
 0x169   :  { %v423_v6 = vmax.f32 %v405_v4, 0.0  ;;  %1468 = vmatpush3.bf16.msra.mxu0 %v1588_v43  ;;  %v1595_v43 = vld [vmem:[#allocation6 + $0x18] sm:$0xff]  }
 0x16a   :  { %1469 = vmatprep.subr.bf16.mxu0 %v1589_v14 }
 0x16b   :  { %v431_v7 = vpack.c.bf16 %v423_v6, %v422_v5 }
 0x16d   :  { %1424 = vmatmul.mubr.bf16.gmra.mrb[12].mxu1 %v431_v7  ;;  %1470 = vmatpush3.bf16.msra.mxu0 %v1589_v14  ;;  %v1596_v14 = vld [vmem:[#allocation6 + $0x20] sm:$0xff]  }
 0x16e   :  { %1471 = vmatprep.subr.bf16.mxu0 %v1590_v9 }
 0x171   :  { %1472 = vmatpush3.bf16.msra.mxu0 %v1590_v9 }
 0x172   :  { %1473 = vmatprep.subr.bf16.mxu0 %v1591_v10 }
 0x175   :  { %1474 = vmatpush3.bf16.msra.mxu0 %v1591_v10  ;;  %v1598_v10 = vld [vmem:[#allocation6 + $0x30] sm:$0xff]  }
 0x210   :  { %v1413_v16 = vpop.f32.mrb[0].mxu1 }
 0x211   :  { %v546_v17 = vadd.f32 %v1413_v16, %v1231_v15  ;;  %v537_v18 = vpop.f32.mrb[1].mxu1  ;;  %v1240_v16 = vld [vmem:[%s1994_s6] ss:$0 sm:$0xff] }
 0x212   :  { %v538_v19 = vadd.f32 %v1231_v15, %v537_v18  ;;  %v1414_v20 = vpop.f32.mrb[2].mxu1 }
 0x213   :  { %v549_v21 = vadd.f32 %v1414_v20, %v1231_v15  ;;  %v540_v22 = vpop.f32.mrb[3].mxu1  ;;  %v602_v24 = vmax.f32 %v546_v17, 0.0 }
 0x214   :  { %v541_v23 = vadd.f32 %v1231_v15, %v540_v22  ;;  %v600_v26 = vmax.f32 %v538_v19, 0.0 }
 0x215   :  { %v603_v25 = vmax.f32 %v549_v21, 0.0 }
 0x216   :  { %v601_v27 = vmax.f32 %v541_v23, 0.0 }
 0x217   :  { %v617_v28 = vpack.c.bf16 %v603_v25, %v602_v24 }
 0x218   :  { %v616_v29 = vpack.c.bf16 %v601_v27, %v600_v26 }
 0x21a   :  { %1443 = vmatprep.mubr.bf16.mxu1 %v616_v29 }
 0x21b   :  { %1444 = vmatmul.mubr.bf16.vlgmr.msra.gmra.mrb[16].mxu1 %v617_v28 }
 0x21c   :  { %1492 = vmatpush3.bf16.msra.mxu1 %v1592_v11  ;;  %v1599_v11 = vld [vmem:[#allocation6 + $0x38] sm:$0xff]  }
 0x21d   :  { %1493 = vmatprep.subr.bf16.mxu1 %v1593_v12 }
 0x220   :  { %v1417_v30 = vpop.f32.mrb[4].mxu1  ;;  %1494 = vmatpush3.bf16.msra.mxu1 %v1593_v12  ;;  %v1249_v12 = vld [vmem:[%s1996_s8] ss:$0 sm:$0xff] }
 0x221   :  { %v562_v31 = vadd.f32 %v1417_v30, %v1231_v15  ;;  %v553_v32 = vpop.f32.mrb[5].mxu1  ;;  %1495 = vmatprep.subr.bf16.mxu1 %v1594_v13 }
 0x222   :  { %v554_v33 = vadd.f32 %v1231_v15, %v553_v32  ;;  %v1418_v34 = vpop.f32.mrb[6].mxu1 }
 0x223   :  { %v565_v35 = vadd.f32 %v1418_v34, %v1231_v15  ;;  %v556_v36 = vpop.f32.mrb[7].mxu1  ;;  %v606_v38 = vmax.f32 %v562_v31, 0.0 }
 0x224   :  { %v557_v37 = vadd.f32 %v1231_v15, %v556_v36  ;;  %v604_v40 = vmax.f32 %v554_v33, 0.0  ;;  %1496 = vmatpush3.bf16.msra.mxu1 %v1594_v13 }
 0x225   :  { %v607_v39 = vmax.f32 %v565_v35, 0.0  ;;  %1497 = vmatprep.subr.bf16.mxu1 %v1595_v43 }
 0x226   :  { %v605_v41 = vmax.f32 %v557_v37, 0.0 }
 0x227   :  { %v619_v42 = vpack.c.bf16 %v607_v39, %v606_v38 }
 0x228   :  { %v618_v44 = vpack.c.bf16 %v605_v41, %v604_v40  ;;  %1498 = vmatpush3.bf16.msra.mxu1 %v1595_v43 }
 0x229   :  { %1499 = vmatprep.subr.bf16.mxu1 %v1596_v14 }
 0x22a   :  { %1447 = vmatprep.mubr.bf16.mxu1 %v618_v44 }
 0x22b   :  { %1448 = vmatmul.mubr.bf16.gmra.mrb[20].mxu1 %v619_v42 }
 0x22c   :  { %1500 = vmatpush3.bf16.msra.mxu1 %v1596_v14 }
 0x230   :  { %v1421_v45 = vpop.f32.mrb[8].mxu1 }
 0x231   :  { %v578_v46 = vadd.f32 %v1421_v45, %v1231_v15  ;;  %v569_v47 = vpop.f32.mrb[9].mxu1 }
 0x232   :  { %v570_v48 = vadd.f32 %v1231_v15, %v569_v47  ;;  %v1422_v49 = vpop.f32.mrb[10].mxu1 }
 0x233   :  { %v581_v50 = vadd.f32 %v1422_v49, %v1231_v15  ;;  %v572_v51 = vpop.f32.mrb[11].mxu1  ;;  %v610_v53 = vmax.f32 %v578_v46, 0.0 }
 0x234   :  { %v573_v52 = vadd.f32 %v1231_v15, %v572_v51  ;;  %v608_v55 = vmax.f32 %v570_v48, 0.0 }
 0x235   :  { %v611_v54 = vmax.f32 %v581_v50, 0.0 }
 0x236   :  { %v609_v56 = vmax.f32 %v573_v52, 0.0 }
 0x237   :  { %v621_v57 = vpack.c.bf16 %v611_v54, %v610_v53 }
 0x238   :  { %v620_v58 = vpack.c.bf16 %v609_v56, %v608_v55 }
 0x23a   :  { %1451 = vmatprep.mubr.bf16.mxu1 %v620_v58 }
 0x23b   :  { %1452 = vmatmul.mubr.bf16.gmra.mrb[24].mxu1 %v621_v57 }
 0x240   :  { %v1425_v59 = vpop.f32.mrb[12].mxu1 }
 0x241   :  { %v594_v60 = vadd.f32 %v1425_v59, %v1231_v15  ;;  %v585_v61 = vpop.f32.mrb[13].mxu1 }
 0x242   :  { %v586_v62 = vadd.f32 %v1231_v15, %v585_v61  ;;  %v1426_v63 = vpop.f32.mrb[14].mxu1 }
 0x243   :  { %v597_v0 = vadd.f32 %v1426_v63, %v1231_v15  ;;  %v588_v1 = vpop.f32.mrb[15].mxu1  ;;  %v614_v3 = vmax.f32 %v594_v60, 0.0 }
 0x244   :  { %v589_v2 = vadd.f32 %v1231_v15, %v588_v1  ;;  %v612_v5 = vmax.f32 %v586_v62, 0.0  ;;  %v1597_v15 = vld [vmem:[#allocation6 + $0x28] sm:$0xff]  }
 0x245   :  { %v615_v4 = vmax.f32 %v597_v0, 0.0  ;;  %1501 = vmatprep.subr.bf16.mxu1 %v1597_v15 }
 0x246   :  { %v613_v6 = vmax.f32 %v589_v2, 0.0  ;;  %1502 = vmatpush3.bf16.msra.mxu1 %v1597_v15 }
 0x247   :  { %v623_v7 = vpack.c.bf16 %v615_v4, %v614_v3  ;;  %1503 = vmatprep.subr.bf16.mxu1 %v1598_v10 }
 0x248   :  { %v622_v8 = vpack.c.bf16 %v613_v6, %v612_v5 }
 0x24a   :  { %1455 = vmatprep.mubr.bf16.mxu1 %v622_v8  ;;  %1504 = vmatpush3.bf16.msra.mxu1 %v1598_v10 }
 0x24b   :  { %1456 = vmatmul.mubr.bf16.gmra.mrb[28].mxu1 %v623_v7  ;;  %1505 = vmatprep.subr.bf16.mxu1 %v1599_v11 }
 0x24e   :  { %1506 = vmatpush3.bf16.msra.mxu1 %v1599_v11 }
 0x2ee   :  { %v1445_v17 = vpop.f32.mrb[16].mxu1 }
 0x2ef   :  { %v738_v18 = vadd.f32 %v1445_v17, %v1240_v16  ;;  %v729_v19 = vpop.f32.mrb[17].mxu1 }
 0x2f0   :  { %v730_v20 = vadd.f32 %v1240_v16, %v729_v19  ;;  %v1446_v21 = vpop.f32.mrb[18].mxu1 }
 0x2f1   :  { %v741_v22 = vadd.f32 %v1446_v21, %v1240_v16  ;;  %v732_v23 = vpop.f32.mrb[19].mxu1  ;;  %v794_v25 = vmax.f32 %v738_v18, 0.0 }
 0x2f2   :  { %v733_v24 = vadd.f32 %v1240_v16, %v732_v23  ;;  %v792_v27 = vmax.f32 %v730_v20, 0.0 }
 0x2f3   :  { %v795_v26 = vmax.f32 %v741_v22, 0.0 }
 0x2f4   :  { %v793_v28 = vmax.f32 %v733_v24, 0.0 }
 0x2f5   :  { %v809_v29 = vpack.c.bf16 %v795_v26, %v794_v25 }
 0x2f6   :  { %v808_v30 = vpack.c.bf16 %v793_v28, %v792_v27 }
 0x2f8   :  { %1475 = vmatprep.mubr.bf16.mxu0 %v808_v30 }
 0x2f9   :  { %1476 = vmatmul.mubr.bf16.vlgmr.msra.gmra.mrb[32].mxu0 %v809_v29 }
 0x2fe   :  { %v1449_v31 = vpop.f32.mrb[20].mxu1 }
 0x2ff   :  { %v754_v32 = vadd.f32 %v1449_v31, %v1240_v16  ;;  %v745_v33 = vpop.f32.mrb[21].mxu1 }
 0x300   :  { %v746_v34 = vadd.f32 %v1240_v16, %v745_v33  ;;  %v1450_v35 = vpop.f32.mrb[22].mxu1 }
 0x301   :  { %v757_v36 = vadd.f32 %v1450_v35, %v1240_v16  ;;  %v748_v37 = vpop.f32.mrb[23].mxu1  ;;  %v798_v39 = vmax.f32 %v754_v32, 0.0 }
 0x302   :  { %v749_v38 = vadd.f32 %v1240_v16, %v748_v37  ;;  %v796_v41 = vmax.f32 %v746_v34, 0.0 }
 0x303   :  { %v799_v40 = vmax.f32 %v757_v36, 0.0 }
 0x304   :  { %v797_v42 = vmax.f32 %v749_v38, 0.0 }
 0x305   :  { %v811_v44 = vpack.c.bf16 %v799_v40, %v798_v39 }
 0x306   :  { %v810_v45 = vpack.c.bf16 %v797_v42, %v796_v41 }
 0x308   :  { %1479 = vmatprep.mubr.bf16.mxu0 %v810_v45 }
 0x309   :  { %1480 = vmatmul.mubr.bf16.gmra.mrb[36].mxu0 %v811_v44 }
 0x30e   :  { %v1453_v46 = vpop.f32.mrb[24].mxu1 }
 0x30f   :  { %v770_v47 = vadd.f32 %v1453_v46, %v1240_v16  ;;  %v761_v48 = vpop.f32.mrb[25].mxu1 }
 0x310   :  { %v762_v49 = vadd.f32 %v1240_v16, %v761_v48  ;;  %v1454_v50 = vpop.f32.mrb[26].mxu1 }
 0x311   :  { %v773_v51 = vadd.f32 %v1454_v50, %v1240_v16  ;;  %v764_v52 = vpop.f32.mrb[27].mxu1  ;;  %v802_v54 = vmax.f32 %v770_v47, 0.0 }
 0x312   :  { %v765_v53 = vadd.f32 %v1240_v16, %v764_v52  ;;  %v800_v56 = vmax.f32 %v762_v49, 0.0 }
 0x313   :  { %v803_v55 = vmax.f32 %v773_v51, 0.0 }
 0x314   :  { %v801_v57 = vmax.f32 %v765_v53, 0.0 }
 0x315   :  { %v813_v58 = vpack.c.bf16 %v803_v55, %v802_v54 }
 0x316   :  { %v812_v59 = vpack.c.bf16 %v801_v57, %v800_v56 }
 0x318   :  { %1483 = vmatprep.mubr.bf16.mxu0 %v812_v59 }
 0x319   :  { %1484 = vmatmul.mubr.bf16.gmra.mrb[40].mxu0 %v813_v58 }
 0x31e   :  { %v1457_v60 = vpop.f32.mrb[28].mxu1 }
 0x31f   :  { %v786_v61 = vadd.f32 %v1457_v60, %v1240_v16  ;;  %v777_v62 = vpop.f32.mrb[29].mxu1 }
 0x320   :  { %v778_v63 = vadd.f32 %v1240_v16, %v777_v62  ;;  %v1458_v0 = vpop.f32.mrb[30].mxu1 }
 0x321   :  { %v789_v1 = vadd.f32 %v1458_v0, %v1240_v16  ;;  %v780_v2 = vpop.f32.mrb[31].mxu1  ;;  %v806_v4 = vmax.f32 %v786_v61, 0.0 }
 0x322   :  { %v781_v3 = vadd.f32 %v1240_v16, %v780_v2  ;;  %v804_v6 = vmax.f32 %v778_v63, 0.0 }
 0x323   :  { %v807_v5 = vmax.f32 %v789_v1, 0.0 }
 0x324   :  { %v805_v7 = vmax.f32 %v781_v3, 0.0 }
 0x325   :  { %v815_v8 = vpack.c.bf16 %v807_v5, %v806_v4  ;;  %v1258_v5 = vld [vmem:[%s1998_s10] ss:$0 sm:$0xff] }
 0x326   :  { %v814_v9 = vpack.c.bf16 %v805_v7, %v804_v6 }
 0x328   :  { %1487 = vmatprep.mubr.bf16.mxu0 %v814_v9 }
 0x329   :  { %1488 = vmatmul.mubr.bf16.gmra.mrb[44].mxu0 %v815_v8 }
 0x3cc   :  { %v1477_v13 = vpop.f32.mrb[32].mxu0 }
 0x3cd   :  { %v930_v43 = vadd.f32 %v1477_v13, %v1249_v12  ;;  %v921_v14 = vpop.f32.mrb[33].mxu0 }
 0x3ce   :  { %v922_v15 = vadd.f32 %v1249_v12, %v921_v14  ;;  %v1478_v16 = vpop.f32.mrb[34].mxu0 }
 0x3cf   :  { %v933_v17 = vadd.f32 %v1478_v16, %v1249_v12  ;;  %v924_v18 = vpop.f32.mrb[35].mxu0  ;;  %v986_v20 = vmax.f32 %v930_v43, 0.0 }
 0x3d0   :  { %v925_v19 = vadd.f32 %v1249_v12, %v924_v18  ;;  %v984_v22 = vmax.f32 %v922_v15, 0.0 }
 0x3d1   :  { %v987_v21 = vmax.f32 %v933_v17, 0.0 }
 0x3d2   :  { %v985_v23 = vmax.f32 %v925_v19, 0.0 }
 0x3d3   :  { %v1001_v24 = vpack.c.bf16 %v987_v21, %v986_v20 }
 0x3d4   :  { %v1000_v25 = vpack.c.bf16 %v985_v23, %v984_v22 }
 0x3d6   :  { %1507 = vmatprep.mubr.bf16.mxu1 %v1000_v25 }
 0x3d7   :  { %1508 = vmatmul.mubr.bf16.vlgmr.msra.gmra.mrb[32].mxu1 %v1001_v24 }
 0x3dc   :  { %v1481_v26 = vpop.f32.mrb[36].mxu0 }
 0x3dd   :  { %v946_v27 = vadd.f32 %v1481_v26, %v1249_v12  ;;  %v937_v28 = vpop.f32.mrb[37].mxu0 }
 0x3de   :  { %v938_v29 = vadd.f32 %v1249_v12, %v937_v28  ;;  %v1482_v30 = vpop.f32.mrb[38].mxu0 }
 0x3df   :  { %v949_v31 = vadd.f32 %v1482_v30, %v1249_v12  ;;  %v940_v32 = vpop.f32.mrb[39].mxu0  ;;  %v990_v34 = vmax.f32 %v946_v27, 0.0 }
 0x3e0   :  { %v941_v33 = vadd.f32 %v1249_v12, %v940_v32  ;;  %v988_v36 = vmax.f32 %v938_v29, 0.0 }
 0x3e1   :  { %v991_v35 = vmax.f32 %v949_v31, 0.0 }
 0x3e2   :  { %v989_v37 = vmax.f32 %v941_v33, 0.0 }
 0x3e3   :  { %v1003_v38 = vpack.c.bf16 %v991_v35, %v990_v34 }
 0x3e4   :  { %v1002_v39 = vpack.c.bf16 %v989_v37, %v988_v36 }
 0x3e6   :  { %1511 = vmatprep.mubr.bf16.mxu1 %v1002_v39 }
 0x3e7   :  { %1512 = vmatmul.mubr.bf16.gmra.mrb[36].mxu1 %v1003_v38 }
 0x3ec   :  { %v1485_v40 = vpop.f32.mrb[40].mxu0 }
 0x3ed   :  { %v962_v41 = vadd.f32 %v1485_v40, %v1249_v12  ;;  %v953_v42 = vpop.f32.mrb[41].mxu0 }
 0x3ee   :  { %v954_v44 = vadd.f32 %v1249_v12, %v953_v42  ;;  %v1486_v45 = vpop.f32.mrb[42].mxu0 }
 0x3ef   :  { %v965_v46 = vadd.f32 %v1486_v45, %v1249_v12  ;;  %v956_v47 = vpop.f32.mrb[43].mxu0  ;;  %v994_v49 = vmax.f32 %v962_v41, 0.0 }
 0x3f0   :  { %v957_v48 = vadd.f32 %v1249_v12, %v956_v47  ;;  %v992_v51 = vmax.f32 %v954_v44, 0.0 }
 0x3f1   :  { %v995_v50 = vmax.f32 %v965_v46, 0.0 }
 0x3f2   :  { %v993_v52 = vmax.f32 %v957_v48, 0.0 }
 0x3f3   :  { %v1005_v53 = vpack.c.bf16 %v995_v50, %v994_v49 }
 0x3f4   :  { %v1004_v54 = vpack.c.bf16 %v993_v52, %v992_v51 }
 0x3f6   :  { %1515 = vmatprep.mubr.bf16.mxu1 %v1004_v54 }
 0x3f7   :  { %1516 = vmatmul.mubr.bf16.gmra.mrb[40].mxu1 %v1005_v53 }
 0x3fc   :  { %v1489_v55 = vpop.f32.mrb[44].mxu0 }
 0x3fd   :  { %v978_v56 = vadd.f32 %v1489_v55, %v1249_v12  ;;  %v969_v57 = vpop.f32.mrb[45].mxu0 }
 0x3fe   :  { %v970_v58 = vadd.f32 %v1249_v12, %v969_v57  ;;  %v1490_v59 = vpop.f32.mrb[46].mxu0 }
 0x3ff   :  { %v981_v60 = vadd.f32 %v1490_v59, %v1249_v12  ;;  %v972_v61 = vpop.f32.mrb[47].mxu0  ;;  %v998_v63 = vmax.f32 %v978_v56, 0.0 }
 0x400   :  { %v973_v62 = vadd.f32 %v1249_v12, %v972_v61  ;;  %v996_v1 = vmax.f32 %v970_v58, 0.0 }
 0x401   :  { %v999_v0 = vmax.f32 %v981_v60, 0.0 }
 0x402   :  { %v997_v2 = vmax.f32 %v973_v62, 0.0 }
 0x403   :  { %v1007_v3 = vpack.c.bf16 %v999_v0, %v998_v63 }
 0x404   :  { %v1006_v4 = vpack.c.bf16 %v997_v2, %v996_v1 }
 0x406   :  { %1519 = vmatprep.mubr.bf16.mxu1 %v1006_v4 }
 0x407   :  { %1520 = vmatmul.mubr.bf16.gmra.mrb[44].mxu1 %v1007_v3 }
 0x4aa   :  { %v1509_v6 = vpop.f32.mrb[32].mxu1 }
 0x4ab   :  { %v1122_v7 = vadd.f32 %v1509_v6, %v1258_v5  ;;  %v1113_v8 = vpop.f32.mrb[33].mxu1 }
 0x4ac   :  { %v1114_v9 = vadd.f32 %v1258_v5, %v1113_v8  ;;  %v1510_v10 = vpop.f32.mrb[34].mxu1 }
 0x4ad   :  { %1178 = vst [vmem:[%s1999_s11 + $0x10] sm:$0xff] %v1122_v7  ;;  %v1125_v11 = vadd.f32 %v1510_v10, %v1258_v5  ;;  %v1116_v12 = vpop.f32.mrb[35].mxu1 }
 0x4ae   :  { %1176 = vst [vmem:[%s1999_s11] sm:$0xff] %v1114_v9  ;;  %v1117_v13 = vadd.f32 %v1258_v5, %v1116_v12 }
 0x4af   :  { %1179 = vst [vmem:[%s1999_s11 + $0x18] sm:$0xff] %v1125_v11 }
 0x4b0   :  { %1177 = vst [vmem:[%s1999_s11 + $0x8] sm:$0xff] %v1117_v13 }
 0x4ba   :  { %v1513_v43 = vpop.f32.mrb[36].mxu1 }
 0x4bb   :  { %v1138_v14 = vadd.f32 %v1513_v43, %v1258_v5  ;;  %v1129_v15 = vpop.f32.mrb[37].mxu1 }
 0x4bc   :  { %v1130_v16 = vadd.f32 %v1258_v5, %v1129_v15  ;;  %v1514_v17 = vpop.f32.mrb[38].mxu1 }
 0x4bd   :  { %1182 = vst [vmem:[%s1999_s11 + $0x30] sm:$0xff] %v1138_v14  ;;  %v1141_v18 = vadd.f32 %v1514_v17, %v1258_v5  ;;  %v1132_v19 = vpop.f32.mrb[39].mxu1 }
 0x4be   :  { %1180 = vst [vmem:[%s1999_s11 + $0x20] sm:$0xff] %v1130_v16  ;;  %v1133_v20 = vadd.f32 %v1258_v5, %v1132_v19 }
 0x4bf   :  { %1183 = vst [vmem:[%s1999_s11 + $0x38] sm:$0xff] %v1141_v18 }
 0x4c0   :  { %1181 = vst [vmem:[%s1999_s11 + $0x28] sm:$0xff] %v1133_v20 }
 0x4ca   :  { %v1517_v21 = vpop.f32.mrb[40].mxu1 }
 0x4cb   :  { %v1154_v22 = vadd.f32 %v1517_v21, %v1258_v5  ;;  %v1145_v23 = vpop.f32.mrb[41].mxu1 }
 0x4cc   :  { %v1146_v24 = vadd.f32 %v1258_v5, %v1145_v23  ;;  %v1518_v25 = vpop.f32.mrb[42].mxu1 }
 0x4cd   :  { %1186 = vst [vmem:[%s1999_s11 + $0x50] sm:$0xff] %v1154_v22  ;;  %v1157_v26 = vadd.f32 %v1518_v25, %v1258_v5  ;;  %v1148_v27 = vpop.f32.mrb[43].mxu1 }
 0x4ce   :  { %1184 = vst [vmem:[%s1999_s11 + $0x40] sm:$0xff] %v1146_v24  ;;  %v1149_v28 = vadd.f32 %v1258_v5, %v1148_v27 }
 0x4cf   :  { %1187 = vst [vmem:[%s1999_s11 + $0x58] sm:$0xff] %v1157_v26 }
 0x4d0   :  { %1185 = vst [vmem:[%s1999_s11 + $0x48] sm:$0xff] %v1149_v28 }
 0x4da   :  { %v1521_v29 = vpop.f32.mrb[44].mxu1 }
 0x4db   :  { %v1170_v30 = vadd.f32 %v1521_v29, %v1258_v5  ;;  %v1161_v31 = vpop.f32.mrb[45].mxu1 }
 0x4dc   :  { %v1162_v32 = vadd.f32 %v1258_v5, %v1161_v31  ;;  %v1522_v33 = vpop.f32.mrb[46].mxu1 }
 0x4dd   :  { %1190 = vst [vmem:[%s1999_s11 + $0x70] sm:$0xff] %v1170_v30  ;;  %v1173_v34 = vadd.f32 %v1522_v33, %v1258_v5  ;;  %v1164_v35 = vpop.f32.mrb[47].mxu1 }
 0x4de   :  { %1188 = vst [vmem:[%s1999_s11 + $0x60] sm:$0xff] %v1162_v32  ;;  %v1165_v36 = vadd.f32 %v1258_v5, %v1164_v35 }
 0x4df   :  { %1191 = vst [vmem:[%s1999_s11 + $0x78] sm:$0xff] %v1173_v34 }
 0x4e0   :  { %1189 = vst [vmem:[%s1999_s11 + $0x68] sm:$0xff] %v1165_v36 }
 0x4e1   :  { %1196 = vsyncpa [#allocation3], 1 }
 0x4e2   :  { %1197 = vsyncpa [#allocation5], 1 }

</bundles_post_ra>
